<compile_context>
chip_gen: v6e
topology: v6e:2x2x1
jax: 0.10.0
libtpu: 0.0.40
codegen_flags: <defaults>
</compile_context>

<pallas_src>
import functools
import math

import jax
import jax.numpy as jnp
from jax.experimental import pallas as pl
from jax.experimental.pallas import tpu as pltpu


# ----------------------------------------------------------------------------
# small helpers
# ----------------------------------------------------------------------------
def _apply_act(y, act):
    if act == "relu":
        return jnp.maximum(y, 0.0)
    if act == "silu":
        return y * jax.nn.sigmoid(y)
    if act == "gelu":
        return jax.nn.gelu(y)  # tanh approximation  # TODO(synk): exact erf GELU
    return y


def _pick_tile(dim, cap, align):
    """Largest tile <= cap that divides dim and respects TPU (8,128) alignment."""
    if dim <= cap:
        return dim
    t = (cap // align) * align
    while t >= align:
        if dim % t == 0:
            return t
        t -= align
    return dim


def _bf16(x):
    return x.astype(jnp.bfloat16)


# ----------------------------------------------------------------------------
# Kernel 1: tiled GEMM + bias + activation  (1x1 convs w/ folded BN, linears)
# ----------------------------------------------------------------------------
def _gemm_kernel(x_ref, w_ref, b_ref, o_ref, acc_ref, *, act, nk):
    @pl.when(pl.program_id(2) == 0)
    def _init():
        acc_ref[...] = jnp.zeros_like(acc_ref)

    acc_ref[...] += jnp.dot(_bf16(x_ref[...]), _bf16(w_ref[...]),
                            preferred_element_type=jnp.float32)

    @pl.when(pl.program_id(2) == nk - 1)
    def _fin():
        o_ref[...] = _apply_act(acc_ref[...] + b_ref[...], act).astype(o_ref.dtype)


def matmul_bias_act(x, w, b, act="none"):
    M, K = x.shape
    N = w.shape[1]
    tm = _pick_tile(M, 256, 8)
    tn = _pick_tile(N, 256, 128)
    tk = _pick_tile(K, 512, 128)
    nk = K // tk
    trans = M * N if act in ("silu", "gelu") else 0
    return pl.pallas_call(
        functools.partial(_gemm_kernel, act=act, nk=nk),
        out_shape=jax.ShapeDtypeStruct((M, N), jnp.float32),
        grid=(M // tm, N // tn, nk),
        in_specs=[
            pl.BlockSpec((tm, tk), lambda i, j, k: (i, k)),
            pl.BlockSpec((tk, tn), lambda i, j, k: (k, j)),
            pl.BlockSpec((1, tn), lambda i, j, k: (0, j)),
        ],
        out_specs=pl.BlockSpec((tm, tn), lambda i, j, k: (i, j)),
        scratch_shapes=[pltpu.VMEM((tm, tn), jnp.float32)],
        compiler_params=pltpu.CompilerParams(
            dimension_semantics=("parallel", "parallel", "arbitrary")),
        cost_estimate=pl.CostEstimate(
            flops=int(2 * M * N * K),
            transcendentals=int(trans),
            bytes_accessed=int(4 * (M * K + K * N + M * N + N))),
    )(x, w, b.reshape(1, N))


# ----------------------------------------------------------------------------
# Kernel 2: tiled GEMM + bias + residual + LayerNorm (post-norm epilogue)
# ----------------------------------------------------------------------------
def _gemm_res_ln_kernel(x_ref, w_ref, b_ref, r_ref, g_ref, bb_ref, o_ref, acc_ref,
                        *, eps, nk):
    @pl.when(pl.program_id(1) == 0)
    def _init():
        acc_ref[...] = jnp.zeros_like(acc_ref)

    acc_ref[...] += jnp.dot(_bf16(x_ref[...]), _bf16(w_ref[...]),
                            preferred_element_type=jnp.float32)

    @pl.when(pl.program_id(1) == nk - 1)
    def _fin():
        y = acc_ref[...] + b_ref[...] + r_ref[...]
        mu = jnp.mean(y, axis=-1, keepdims=True)
        var = jnp.mean((y - mu) ** 2, axis=-1, keepdims=True)
        o_ref[...] = ((y - mu) * jax.lax.rsqrt(var + eps) * g_ref[...]
                      + bb_ref[...]).astype(o_ref.dtype)


def gemm_residual_layernorm(x, w, b, residual, gamma, beta, eps=1e-5):
    M, K = x.shape
    N = w.shape[1]
    tm = _pick_tile(M, 256, 8)
    tk = _pick_tile(K, 512, 128)
    nk = K // tk
    return pl.pallas_call(
        functools.partial(_gemm_res_ln_kernel, eps=eps, nk=nk),
        out_shape=jax.ShapeDtypeStruct((M, N), jnp.float32),
        grid=(M // tm, nk),
        in_specs=[
            pl.BlockSpec((tm, tk), lambda i, k: (i, k)),
            pl.BlockSpec((tk, N), lambda i, k: (k, 0)),
            pl.BlockSpec((1, N), lambda i, k: (0, 0)),
            pl.BlockSpec((tm, N), lambda i, k: (i, 0)),
            pl.BlockSpec((1, N), lambda i, k: (0, 0)),
            pl.BlockSpec((1, N), lambda i, k: (0, 0)),
        ],
        out_specs=pl.BlockSpec((tm, N), lambda i, k: (i, 0)),
        scratch_shapes=[pltpu.VMEM((tm, N), jnp.float32)],
        compiler_params=pltpu.CompilerParams(
            dimension_semantics=("parallel", "arbitrary")),
        cost_estimate=pl.CostEstimate(
            flops=int(2 * M * N * K + 10 * M * N),
            transcendentals=int(M),
            bytes_accessed=int(4 * (M * K + K * N + 2 * M * N + 3 * N))),
    )(x, w, b.reshape(1, N), residual, gamma.reshape(1, N), beta.reshape(1, N))


# ----------------------------------------------------------------------------
# Kernel 3: multi-head self-attention, all heads of one batch element / step
# ----------------------------------------------------------------------------
def _attn_kernel(qk_ref, v_ref, o_ref, *, nhead, scale, D):
    qk = qk_ref[0]          # (S, 2D): [Q | K] projections
    v = v_ref[0]            # (S, D)
    Dh = D // nhead
    outs = []
    for h in range(nhead):
        qh = _bf16(qk[:, h * Dh:(h + 1) * Dh])
        kh = _bf16(qk[:, D + h * Dh:D + (h + 1) * Dh])
        vh = _bf16(v[:, h * Dh:(h + 1) * Dh])
        s = jax.lax.dot_general(qh, kh, (((1,), (1,)), ((), ())),
                                preferred_element_type=jnp.float32) * scale
        m = jnp.max(s, axis=-1, keepdims=True)
        p = jnp.exp(s - m)
        p = p / jnp.sum(p, axis=-1, keepdims=True)
        outs.append(jnp.dot(_bf16(p), vh, preferred_element_type=jnp.float32))
    o_ref[0] = jnp.concatenate(outs, axis=-1)


def attention(qk, v, nhead):
    B, S, D = v.shape
    scale = 1.0 / math.sqrt(D // nhead)
    return pl.pallas_call(
        functools.partial(_attn_kernel, nhead=nhead, scale=scale, D=D),
        out_shape=jax.ShapeDtypeStruct((B, S, D), jnp.float32),
        grid=(B,),
        in_specs=[pl.BlockSpec((1, S, 2 * D), lambda b: (b, 0, 0)),
                  pl.BlockSpec((1, S, D), lambda b: (b, 0, 0))],
        out_specs=pl.BlockSpec((1, S, D), lambda b: (b, 0, 0)),
        compiler_params=pltpu.CompilerParams(dimension_semantics=("parallel",)),
    )(qk, v)


# ----------------------------------------------------------------------------
# Kernel 4: fused RepVGG block: conv3x3 + conv1x1 + (bias) + act [+ skip add]
#           (no HBM im2col: 9 shifted matmuls on one padded VMEM tile)
# ----------------------------------------------------------------------------
def _repvgg_kernel(x_ref, w3_ref, w1_ref, b_ref, *rest, H, W, C, Cout, act, add_skip):
    if add_skip:
        skip_ref, o_ref = rest
    else:
        (o_ref,) = rest
    xp = _bf16(x_ref[0])                          # (H+2, W+2, C) zero-padded
    acc = jnp.zeros((H * W, Cout), jnp.float32)
    for di in range(3):
        for dj in range(3):
            patch = xp[di:di + H, dj:dj + W, :].reshape(H * W, C)
            acc = acc + jnp.dot(patch, _bf16(w3_ref[di * 3 + dj]),
                                preferred_element_type=jnp.float32)
    center = xp[1:1 + H, 1:1 + W, :].reshape(H * W, C)
    acc = acc + jnp.dot(center, _bf16(w1_ref[...]),
                        preferred_element_type=jnp.float32)
    y = _apply_act(acc + b_ref[...], act)
    if add_skip:
        y = y + skip_ref[0].reshape(H * W, Cout)
    o_ref[0] = y.reshape(H, W, Cout)


def repvgg_block(x, p, act, skip=None):
    B, H, W, C = x.shape
    Cout = p["w3"].shape[2]
    xp = jnp.pad(x, ((0, 0), (1, 1), (1, 1), (0, 0)))
    in_specs = [pl.BlockSpec((1, H + 2, W + 2, C), lambda b: (b, 0, 0, 0)),
                pl.BlockSpec((9, C, Cout), lambda b: (0, 0, 0)),
                pl.BlockSpec((C, Cout), lambda b: (0, 0)),
                pl.BlockSpec((1, Cout), lambda b: (0, 0))]
    args = [xp, p["w3"], p["w1"], p["b"].reshape(1, Cout)]
    if skip is not None:
        in_specs.append(pl.BlockSpec((1, H, W, Cout), lambda b: (b, 0, 0, 0)))
        args.append(skip)
    return pl.pallas_call(
        functools.partial(_repvgg_kernel, H=H, W=W, C=C, Cout=Cout, act=act,
                          add_skip=skip is not None),
        out_shape=jax.ShapeDtypeStruct((B, H, W, Cout), jnp.float32),
        grid=(B,),
        in_specs=in_specs,
        out_specs=pl.BlockSpec((1, H, W, Cout), lambda b: (b, 0, 0, 0)),
        compiler_params=pltpu.CompilerParams(dimension_semantics=("parallel",)),
    )(*args)


# ----------------------------------------------------------------------------
# Kernel 5: stride-2 3x3 downsample conv (+BN folded, +act), parity-split input
# ----------------------------------------------------------------------------
def _downsample_kernel(p00_ref, p01_ref, p10_ref, p11_ref, w_ref, b_ref, o_ref,
                       *, Ho, Wo, C, Cout, act):
    maps = ((p00_ref[0], p01_ref[0]), (p10_ref[0], p11_ref[0]))
    acc = jnp.zeros((Ho * Wo, Cout), jnp.float32)
    for di in range(3):
        for dj in range(3):
            m = maps[di % 2][dj % 2]
            patch = m[di // 2:di // 2 + Ho, dj // 2:dj // 2 + Wo, :]
            acc = acc + jnp.dot(_bf16(patch.reshape(Ho * Wo, C)),
                                _bf16(w_ref[di * 3 + dj]),
                                preferred_element_type=jnp.float32)
    o_ref[0] = _apply_act(acc + b_ref[...], act).reshape(Ho, Wo, Cout)


def conv3x3_stride2(x, w3, bias, act):
    B, H, W, C = x.shape
    Cout = w3.shape[2]
    Ho, Wo = (H + 1) // 2, (W + 1) // 2
    ph = H + 2 + (H % 2)                      # pad to even so parities match
    pw = W + 2 + (W % 2)
    xp = jnp.pad(x, ((0, 0), (1, ph - H - 1), (1, pw - W - 1), (0, 0)))
    p00 = xp[:, 0::2, 0::2, :]
    p01 = xp[:, 0::2, 1::2, :]
    p10 = xp[:, 1::2, 0::2, :]
    p11 = xp[:, 1::2, 1::2, :]
    hp, wp = ph // 2, pw // 2
    return pl.pallas_call(
        functools.partial(_downsample_kernel, Ho=Ho, Wo=Wo, C=C, Cout=Cout, act=act),
        out_shape=jax.ShapeDtypeStruct((B, Ho, Wo, Cout), jnp.float32),
        grid=(B,),
        in_specs=[pl.BlockSpec((1, hp, wp, C), lambda b: (b, 0, 0, 0))] * 4
                 + [pl.BlockSpec((9, C, Cout), lambda b: (0, 0, 0)),
                    pl.BlockSpec((1, Cout), lambda b: (0, 0))],
        out_specs=pl.BlockSpec((1, Ho, Wo, Cout), lambda b: (b, 0, 0, 0)),
        compiler_params=pltpu.CompilerParams(dimension_semantics=("parallel",)),
    )(p00, p01, p10, p11, w3, bias.reshape(1, Cout))


# ----------------------------------------------------------------------------
# Kernel 6: CSP entry — conv1/conv2 1x1 on the (virtual) concat, with the
#           channel-concat split into two matmuls and the nearest-2x upsample
#           done in VMEM (no HBM concat / upsample materialization).
# ----------------------------------------------------------------------------
def _upsample2x_inkernel(x):
    h, w, c = x.shape
    x = jnp.broadcast_to(x[:, None, :, :], (h, 2, w, c)).reshape(2 * h, w, c)
    x = jnp.broadcast_to(x[:, :, None, :], (2 * h, w, 2, c)).reshape(2 * h, 2 * w, c)
    return x


def _csp_entry_kernel(xa_ref, xb_ref, w1a_ref, w1b_ref, w2a_ref, w2b_ref,
                      b1_ref, b2_ref, x1_ref, x2_ref, *, act, upsample_a, H, W, C):
    xa = xa_ref[0]
    xb = xb_ref[0]
    if upsample_a:
        xa = _upsample2x_inkernel(xa)
    a = _bf16(xa.reshape(H * W, C))
    b = _bf16(xb.reshape(H * W, C))
    y1 = (jnp.dot(a, _bf16(w1a_ref[...]), preferred_element_type=jnp.float32)
          + jnp.dot(b, _bf16(w1b_ref[...]), preferred_element_type=jnp.float32)
          + b1_ref[...])
    y2 = (jnp.dot(a, _bf16(w2a_ref[...]), preferred_element_type=jnp.float32)
          + jnp.dot(b, _bf16(w2b_ref[...]), preferred_element_type=jnp.float32)
          + b2_ref[...])
    x1_ref[0] = _apply_act(y1, act).reshape(H, W, -1)
    x2_ref[0] = _apply_act(y2, act).reshape(H, W, -1)


def csp_entry(xa, xb, p, act, upsample_a):
    B, H, W, C = xb.shape
    ha, wa = xa.shape[1], xa.shape[2]
    Cout = p["conv1"]["w"].shape[1]
    w1, w2 = p["conv1"]["w"], p["conv2"]["w"]
    return pl.pallas_call(
        functools.partial(_csp_entry_kernel, act=act, upsample_a=upsample_a,
                          H=H, W=W, C=C),
        out_shape=(jax.ShapeDtypeStruct((B, H, W, Cout), jnp.float32),
                   jax.ShapeDtypeStruct((B, H, W, Cout), jnp.float32)),
        grid=(B,),
        in_specs=[pl.BlockSpec((1, ha, wa, C), lambda b: (b, 0, 0, 0)),
                  pl.BlockSpec((1, H, W, C), lambda b: (b, 0, 0, 0)),
                  pl.BlockSpec((C, Cout), lambda b: (0, 0)),
                  pl.BlockSpec((C, Cout), lambda b: (0, 0)),
                  pl.BlockSpec((C, Cout), lambda b: (0, 0)),
                  pl.BlockSpec((C, Cout), lambda b: (0, 0)),
                  pl.BlockSpec((1, Cout), lambda b: (0, 0)),
                  pl.BlockSpec((1, Cout), lambda b: (0, 0))],
        out_specs=[pl.BlockSpec((1, H, W, Cout), lambda b: (b, 0, 0, 0))] * 2,
        compiler_params=pltpu.CompilerParams(dimension_semantics=("parallel",)),
    )(xa, xb, w1[:C], w1[C:], w2[:C], w2[C:],
      p["conv1"]["b"].reshape(1, Cout), p["conv2"]["b"].reshape(1, Cout))


# ----------------------------------------------------------------------------
# composite blocks
# ----------------------------------------------------------------------------
def upsample2x_nearest(x):
    return jnp.repeat(jnp.repeat(x, 2, axis=1), 2, axis=2)


def pad_like(x, ref):
    dh = ref.shape[1] - x.shape[1]
    dw = ref.shape[2] - x.shape[2]
    if dh or dw:
        x = jnp.pad(x, ((0, 0), (0, dh), (0, dw), (0, 0)))
    return x


def csp_rep_layer(xa, xb, p, act, upsample_a):
    """CSPRepLayer(concat([xa (maybe 2x-upsampled), xb])); expansion=1 -> conv3=Identity."""
    B, H, W, C = xb.shape
    if upsample_a and (xa.shape[1] * 2 != H or xa.shape[2] * 2 != W):
        # TODO(synk): odd spatial sizes — rare fallback materializes upsample+pad.
        xa = pad_like(upsample2x_nearest(xa), xb)
        upsample_a = False
    x1, x2 = csp_entry(xa, xb, p, act, upsample_a)
    nb = len(p["blocks"])
    if nb == 0:
        return x1 + x2
    for i, bp in enumerate(p["blocks"]):
        x1 = repvgg_block(x1, bp, act, skip=x2 if i == nb - 1 else None)
    return x1


def sincos_pos_embed(w, h, dim, temperature):
    gw = jnp.arange(w, dtype=jnp.float32)
    gh = jnp.arange(h, dtype=jnp.float32)
    gw, gh = jnp.meshgrid(gw, gh, indexing="ij")
    pos_dim = dim // 4
    omega = jnp.arange(pos_dim, dtype=jnp.float32) / pos_dim
    omega = 1.0 / (temperature ** omega)
    out_w = gw.reshape(-1)[:, None] * omega[None]
    out_h = gh.reshape(-1)[:, None] * omega[None]
    return jnp.concatenate(
        [jnp.sin(out_w), jnp.cos(out_w), jnp.sin(out_h), jnp.cos(out_h)], axis=1)[None]


def transformer_encoder_layer(src, pos, p, nhead, enc_act):
    """Post-norm encoder layer (dropout = 0)."""
    B, S, D = src.shape
    src2d = src.reshape(B * S, D)
    qk_in = (src + pos).reshape(B * S, D)
    wqk = jnp.concatenate([p["attn"]["wq"], p["attn"]["wk"]], axis=1)
    bqk = jnp.concatenate([p["attn"]["bq"], p["attn"]["bk"]], axis=0)
    qk = matmul_bias_act(qk_in, wqk, bqk).reshape(B, S, 2 * D)
    v = matmul_bias_act(src2d, p["attn"]["wv"], p["attn"]["bv"]).reshape(B, S, D)
    attn = attention(qk, v, nhead).reshape(B * S, D)
    # out-proj + residual + LayerNorm1, fused
    src2d = gemm_residual_layernorm(attn, p["attn"]["wo"], p["attn"]["bo"],
                                    src2d, p["ln1"]["g"], p["ln1"]["b"])
    # FFN: lin1+act, then lin2 + residual + LayerNorm2, fused
    h1 = matmul_bias_act(src2d, p["lin1"]["w"], p["lin1"]["b"], act=enc_act)
    src2d = gemm_residual_layernorm(h1, p["lin2"]["w"], p["lin2"]["b"],
                                    src2d, p["ln2"]["g"], p["ln2"]["b"])
    return src2d.reshape(B, S, D)


# ----------------------------------------------------------------------------
# HybridEncoder forward
# ----------------------------------------------------------------------------
def hybrid_encoder_forward(feats_nchw, params, cfg, query_mask=None, vp=None):
    hidden = cfg["hidden_dim"]
    act = cfg["act"]
    enc_act = cfg.get("enc_act", "gelu")
    feats = [jnp.transpose(f, (0, 2, 3, 1)).astype(jnp.float32) for f in feats_nchw]
    B = feats[0].shape[0]
    nlev = len(feats)

    # 1) input projection: 1x1 conv + folded BN (no activation)
    proj = []
    for i, f in enumerate(feats):
        Bx, H, W, C = f.shape
        p = params["input_proj"][i]
        y = matmul_bias_act(f.reshape(Bx * H * W, C), p["w"], p["b"])
        proj.append(y.reshape(Bx, H, W, hidden))

    # 2) transformer encoder on selected level(s)
    for li, enc_ind in enumerate(cfg["use_encoder_idx"]):
        x = proj[enc_ind]
        Bx, h, w, C = x.shape
        src = x.reshape(Bx, h * w, C)
        pos = sincos_pos_embed(w, h, C, cfg["pe_temperature"])
        for layer_p in params["encoder"][li]:
            src = transformer_encoder_layer(src, pos, layer_p, cfg["nhead"], enc_act)
        proj[enc_ind] = src.reshape(Bx, h, w, C)

    # 3) FPN top-down path (lateral 1x1, fused upsample+concat-split CSP)
    inner = [proj[-1]]
    for idx in range(nlev - 1, 0, -1):
        k = nlev - 1 - idx
        feat_high = inner[0]
        feat_low = proj[idx - 1]
        Bh, hh, wh, _ = feat_high.shape
        lat = params["lateral"][k]
        feat_high = matmul_bias_act(feat_high.reshape(Bh * hh * wh, hidden),
                                    lat["w"], lat["b"], act=act
                                    ).reshape(Bh, hh, wh, hidden)
        inner[0] = feat_high
        inner.insert(0, csp_rep_layer(feat_high, feat_low, params["fpn"][k],
                                      act, upsample_a=True))

    # 4) PAN bottom-up path (stride-2 conv, fused concat-split CSP)
    outs = [inner[0]]
    for idx in range(nlev - 1):
        dp = params["downsample"][idx]
        down = conv3x3_stride2(outs[-1], dp["w"], dp["b"], act)
        outs.append(csp_rep_layer(down, inner[idx + 1], params["pan"][idx],
                                  act, upsample_a=False))

    # TODO(synk): visual-prompt branch (roi_align / MSDeformAttn /
    # PositionEmbeddingRandom) is not defined in the reference module;
    # encoded_support stays the zero initialization of the PyTorch forward.
    mask_dtype = query_mask.dtype if query_mask is not None else jnp.bool_
    support_feat = jnp.zeros((B, cfg["max_support_len"], hidden), jnp.float32)
    support_mask = jnp.zeros((B, cfg["max_support_len"]), mask_dtype)

    outs_nchw = [jnp.transpose(o, (0, 3, 1, 2)) for o in outs]
    prompt_dict = {"encoded_support": support_feat, "support_token_mask": support_mask}
    return outs_nchw, prompt_dict


# ----------------------------------------------------------------------------
# Deterministic synthetic parameters (shapes follow __init__, BN folded)
# ----------------------------------------------------------------------------
def _rand_bn(key, cout):
    k1, k2, k3, k4 = jax.random.split(key, 4)
    gamma = 1.0 + 0.1 * jax.random.normal(k1, (cout,), jnp.float32)
    beta = 0.1 * jax.random.normal(k2, (cout,), jnp.float32)
    mean = 0.1 * jax.random.normal(k3, (cout,), jnp.float32)
    var = 1.0 + 0.1 * jax.random.uniform(k4, (cout,), jnp.float32)
    scale = gamma / jnp.sqrt(var + 1e-5)
    return scale, beta - mean * scale


def init_conv_bn_1x1(key, cin, cout):
    kw, kbn = jax.random.split(key)
    w = 0.05 * jax.random.normal(kw, (cin, cout), jnp.float32)
    scale, bias = _rand_bn(kbn, cout)
    return {"w": w * scale[None, :], "b": bias}


def init_conv_bn_3x3(key, cin, cout):
    # w[t, ci, co] == torch_weight[co, ci, t // 3, t % 3] * bn_scale[co]
    kw, kbn = jax.random.split(key)
    w = 0.05 * jax.random.normal(kw, (9, cin, cout), jnp.float32)
    scale, bias = _rand_bn(kbn, cout)
    return {"w": w * scale[None, None, :], "b": bias}


def init_linear(key, din, dout):
    k1, k2 = jax.random.split(key)
    return {"w": 0.05 * jax.random.normal(k1, (din, dout), jnp.float32),
            "b": 0.05 * jax.random.normal(k2, (dout,), jnp.float32)}


def init_ln(key, d):
    k1, k2 = jax.random.split(key)
    return {"g": 1.0 + 0.1 * jax.random.normal(k1, (d,), jnp.float32),
            "b": 0.1 * jax.random.normal(k2, (d,), jnp.float32)}


def init_repvgg(key, c):
    k1, k2 = jax.random.split(key)
    c3 = init_conv_bn_3x3(k1, c, c)
    c1 = init_conv_bn_1x1(k2, c, c)
    return {"w3": c3["w"], "w1": c1["w"], "b": c3["b"] + c1["b"]}


def init_csp(key, cin, cout, nblocks):
    ks = jax.random.split(key, 2 + max(nblocks, 1))
    return {"conv1": init_conv_bn_1x1(ks[0], cin, cout),
            "conv2": init_conv_bn_1x1(ks[1], cin, cout),
            "blocks": [init_repvgg(ks[2 + i], cout) for i in range(nblocks)]}


def init_encoder_layer(key, d, dff):
    kq, kk, kv, ko, kl1, kl2, kn1, kn2 = jax.random.split(key, 8)
    attn = {}
    for name, kx in zip("qkvo", (kq, kk, kv, ko)):
        p = init_linear(kx, d, d)
        attn["w" + name] = p["w"]
        attn["b" + name] = p["b"]
    return {"attn": attn,
            "lin1": init_linear(kl1, d, dff),
            "lin2": init_linear(kl2, dff, d),
            "ln1": init_ln(kn1, d),
            "ln2": init_ln(kn2, d)}


def init_params(key, cfg):
    in_ch = cfg["in_channels"]
    hidden = cfg["hidden_dim"]
    nlev = len(in_ch)
    keys = jax.random.split(key, 6)
    params = {}
    params["input_proj"] = [init_conv_bn_1x1(k, c, hidden)
                            for k, c in zip(jax.random.split(keys[0], nlev), in_ch)]
    params["encoder"] = [
        [init_encoder_layer(k2, hidden, cfg["dim_feedforward"])
         for k2 in jax.random.split(k, cfg["num_encoder_layers"])]
        for k in jax.random.split(keys[1], len(cfg["use_encoder_idx"]))]
    params["lateral"] = [init_conv_bn_1x1(k, hidden, hidden)
                         for k in jax.random.split(keys[2], nlev - 1)]
    params["fpn"] = [init_csp(k, hidden * 2, hidden, cfg["num_blocks"])
                     for k in jax.random.split(keys[3], nlev - 1)]
    params["downsample"] = [init_conv_bn_3x3(k, hidden, hidden)
                            for k in jax.random.split(keys[4], nlev - 1)]
    params["pan"] = [init_csp(k, hidden * 2, hidden, cfg["num_blocks"])
                     for k in jax.random.split(keys[5], nlev - 1)]
    return params


# ----------------------------------------------------------------------------
if __name__ == "__main__":
    cfg = dict(
        in_channels=[8, 16, 32],
        hidden_dim=32,
        nhead=4,
        dim_feedforward=64,
        use_encoder_idx=[2],
        num_encoder_layers=1,
        pe_temperature=10000.0,
        num_blocks=3,          # round(3 * depth_mult), depth_mult = 1.0
        act="silu",
        enc_act="gelu",
        max_support_len=8,
    )

    key = jax.random.PRNGKey(0)
    kp, k0, k1, k2 = jax.random.split(key, 4)
    params = init_params(kp, cfg)

    B = 2
    feats = [
        jax.random.normal(k0, (B, 8, 16, 16), jnp.float32),   # stride 8 level
        jax.random.normal(k1, (B, 16, 8, 8), jnp.float32),    # stride 16 level
        jax.random.normal(k2, (B, 32, 4, 4), jnp.float32),    # stride 32 level
    ]
    query_mask = jnp.ones((B, 16, 16), jnp.bool_)  # signature parity; dtype source only

    outs, prompt_dict = hybrid_encoder_forward(
        feats, params, cfg, query_mask=query_mask, vp=None)

    for o in outs:
        jax.block_until_ready(o)
    jax.block_until_ready(prompt_dict["encoded_support"])

    assert outs[0].shape == (B, cfg["hidden_dim"], 16, 16)
    assert outs[1].shape == (B, cfg["hidden_dim"], 8, 8)
    assert outs[2].shape == (B, cfg["hidden_dim"], 4, 4)
    assert prompt_dict["encoded_support"].shape == (B, cfg["max_support_len"], cfg["hidden_dim"])
    for o in outs:
        assert not bool(jnp.any(jnp.isnan(o)))
    print("KERNEL_OK")
</pallas_src>

<mosaic_0001>
module attributes {stable_mosaic.version = 11 : i64} {
  func.func @_gemm_kernel(%arg0: i32, %arg1: i32, %arg2: i32, %arg3: memref<256x8xf32, #tpu.memory_space<vmem>>, %arg4: memref<8x32xf32, #tpu.memory_space<vmem>>, %arg5: memref<1x32xf32, #tpu.memory_space<vmem>>, %arg6: memref<256x32xf32, #tpu.memory_space<vmem>>, %arg7: memref<256x32xf32, #tpu.memory_space<vmem>>) attributes {dimension_semantics = [#tpu.dimension_semantics<parallel>, #tpu.dimension_semantics<parallel>, #tpu.dimension_semantics<arbitrary>], iteration_bounds = array<i64: 2, 1, 1>, scalar_prefetch = 0 : i64, scratch_operands = 1 : i64, tpu.core_type = #tpu.core_type<tc>, window_params = [{transform_indices = @transform_0, window_bounds = array<i64: 256, 8>}, {transform_indices = @transform_1, window_bounds = array<i64: 8, 32>}, {transform_indices = @transform_2, window_bounds = array<i64: 1, 32>}, {transform_indices = @transform_3, window_bounds = array<i64: 256, 32>}]} {
    %c0_i32 = arith.constant 0 : i32
    %0 = arith.cmpi eq, %arg2, %c0_i32 : i32
    %1 = arith.extui %0 : i1 to i32
    %c0_i32_0 = arith.constant 0 : i32
    %2 = arith.cmpi ne, %1, %c0_i32_0 : i32
    scf.if %2 {
      %cst_10 = arith.constant 0.000000e+00 : f32
      %14 = vector.broadcast %cst_10 : f32 to vector<256x32xf32>
      %c0_11 = arith.constant 0 : index
      %c0_12 = arith.constant 0 : index
      %15 = vector.load %arg7[%c0_11, %c0_12] : memref<256x32xf32, #tpu.memory_space<vmem>>, vector<256x32xf32>
      tpu.vector_store %arg7[%c0_11, %c0_12], %14 {strides = array<i32>} : memref<256x32xf32, #tpu.memory_space<vmem>>, vector<256x32xf32>,
    } else {
    }
    %c0 = arith.constant 0 : index
    %c0_1 = arith.constant 0 : index
    %3 = vector.load %arg7[%c0, %c0_1] : memref<256x32xf32, #tpu.memory_space<vmem>>, vector<256x32xf32>
    %c0_2 = arith.constant 0 : index
    %c0_3 = arith.constant 0 : index
    %4 = vector.load %arg3[%c0_2, %c0_3] : memref<256x8xf32, #tpu.memory_space<vmem>>, vector<256x8xf32>
    %5 = arith.truncf %4 : vector<256x8xf32> to vector<256x8xbf16>
    %c0_4 = arith.constant 0 : index
    %c0_5 = arith.constant 0 : index
    %6 = vector.load %arg4[%c0_4, %c0_5] : memref<8x32xf32, #tpu.memory_space<vmem>>, vector<8x32xf32>
    %7 = arith.truncf %6 : vector<8x32xf32> to vector<8x32xbf16>
    %cst = arith.constant dense<0.000000e+00> : vector<256x32xf32>
    %8 = tpu.matmul %5, %7, %cst {dimension_numbers = #tpu.dot_dimension_numbers<[1], [0], [0], [1], [0, 0, 1, 1], [], []>} : vector<256x8xbf16>, vector<8x32xbf16>, vector<256x32xf32> -> vector<256x32xf32>
    %9 = arith.addf %3, %8 : vector<256x32xf32>
    %c0_6 = arith.constant 0 : index
    %c0_7 = arith.constant 0 : index
    %10 = vector.load %arg7[%c0_6, %c0_7] : memref<256x32xf32, #tpu.memory_space<vmem>>, vector<256x32xf32>
    tpu.vector_store %arg7[%c0_6, %c0_7], %9 {strides = array<i32>} : memref<256x32xf32, #tpu.memory_space<vmem>>, vector<256x32xf32>,
    %c0_i32_8 = arith.constant 0 : i32
    %11 = arith.cmpi eq, %arg2, %c0_i32_8 : i32
    %12 = arith.extui %11 : i1 to i32
    %c0_i32_9 = arith.constant 0 : i32
    %13 = arith.cmpi ne, %12, %c0_i32_9 : i32
    scf.if %13 {
      %c0_10 = arith.constant 0 : index
      %c0_11 = arith.constant 0 : index
      %14 = vector.load %arg7[%c0_10, %c0_11] : memref<256x32xf32, #tpu.memory_space<vmem>>, vector<256x32xf32>
      %c0_12 = arith.constant 0 : index
      %c0_13 = arith.constant 0 : index
      %15 = vector.load %arg5[%c0_12, %c0_13] : memref<1x32xf32, #tpu.memory_space<vmem>>, vector<1x32xf32>
      %16 = vector.broadcast %15 : vector<1x32xf32> to vector<256x32xf32>
      %17 = arith.addf %14, %16 : vector<256x32xf32>
      %c0_14 = arith.constant 0 : index
      %c0_15 = arith.constant 0 : index
      %18 = vector.load %arg6[%c0_14, %c0_15] : memref<256x32xf32, #tpu.memory_space<vmem>>, vector<256x32xf32>
      tpu.vector_store %arg6[%c0_14, %c0_15], %17 {strides = array<i32>} : memref<256x32xf32, #tpu.memory_space<vmem>>, vector<256x32xf32>,
    } else {
    }
    return
  }
  func.func @transform_0(%arg0: i32, %arg1: i32, %arg2: i32) -> (i32, i32) {
    %c0_i32 = arith.constant 0 : i32
    return %arg0, %arg2 : i32, i32
  }
  func.func @transform_1(%arg0: i32, %arg1: i32, %arg2: i32) -> (i32, i32) {
    %c0_i32 = arith.constant 0 : i32
    return %arg2, %arg1 : i32, i32
  }
  func.func @transform_2(%arg0: i32, %arg1: i32, %arg2: i32) -> (i32, i32) {
    %c0_i32 = arith.constant 0 : i32
    %c0_i32_0 = arith.constant 0 : i32
    return %c0_i32, %arg1 : i32, i32
  }
  func.func @transform_3(%arg0: i32, %arg1: i32, %arg2: i32) -> (i32, i32) {
    %c0_i32 = arith.constant 0 : i32
    return %arg0, %arg1 : i32, i32
  }
}

</mosaic_0001>

<bundles_post_ra>
// kernel: tpu_custom_call.1
= control target key start
LH: loop header
LB: loop body
LE: loop exit
PB: predicated region body
PF: predicated region fallthrough
CT: control target
= control target key end

     0   :  { %s1025_s12 = smov 0   ;;  %s1027_s13 = smov 0   ;;  %s1301_s0 = inlined_call_operand.vmem [shape: f32[512,8], index: 0, kind: input, shape index: {}]   ;;  %s1302_s1 = inlined_call_operand.vmem [shape: f32[8,32], index: 1, kind: input, shape index: {}]   ;;  %s1303_s2 = inlined_call_operand.vmem [shape: f32[1,32], index: 2, kind: input, shape index: {}]   ;;  %s1304_s3 = inlined_call_operand.vmem [shape: f32[512,32], index: 3, kind: output, shape index: {}]  }
   0x1   :  { %s1029_s14 = smov 0  }
   0x2 LB: > { %s32_s15 = sadd.s32 1, %s998_s13  ;;  %p876_p0 = scmp.ge.s32.totalorder %s1002_s14, 1  ;;  %s1002_s14 = sphi %s1029_s14, %s13_s14   ;;  %s998_s13 = sphi %s1027_s13, %s1307_s13   ;;  %s994_s12 = sphi %s1025_s12, %s1306_s12  }
   0x3   : > { %p34_p1 = scmp.ge.s32.totalorder %s32_s15, 2  ;;  %p186_p2 = scmp.lt.s32.totalorder %s1002_s14, 3 }
   0x5   : > { %s1309_s15 = smov (%p34_p1, %s32_s15), 0  ;;  %p187_p3 = pnand %p876_p0, %p186_p2 }
   0x6   : > { %s877_s18 = sshll.u32 (!%p187_p3), %s994_s12, 5 }
   0x7   : > { %190 = sbr.rel (%p187_p3) target bundleno = 257 (0x101), region = 32  ;;  %p1051_p4 = scmp.lt.s32.totalorder (!%p187_p3), %s877_s18, 63 }
   0xc   : > { %v372_v0 = vld [vmem:[%s1302_s1] sm:$0xff]  ;;  %vm423_vm0 = vcmask 1043456   ;;  %vm259_vm1 = vcmask 261120   ;;  %v1004_v2 = vmov 0.0   ;;  %s1311_s18 = smov (!%p1051_p4, %s877_s18), 63  ;;  %vm374_vm2 = vcmask 64512  }
   0xd   : > { %v373_v1 = vpack.c.bf16 %v372_v0, %v372_v0  ;;  %262 = vst.msk [vmem:[#allocation2 + $0x10] sm:$0xff] %vm259_vm1, %v1004_v2  ;;  %260 = vst.msk [vmem:[#allocation2] sm:$0xff] %vm259_vm1, %v1004_v2  ;;  %s878_s20 = sshll.u32 %s1311_s18, 3 }
   0xe   : > { %261 = vst.msk [vmem:[#allocation2 + $0x8] sm:$0xff] %vm259_vm1, %v1004_v2  ;;  %263 = vst.msk [vmem:[#allocation2 + $0x18] sm:$0xff] %vm259_vm1, %v1004_v2  ;;  %s1102_s23 = scalar_lea.vmem %s1301_s0, %s878_s20  ;;  %s1169_s28 = scalar_lea.vmem %s1304_s3, %s878_s20 }
   0xf   : > { %264 = vst.msk [vmem:[#allocation2 + $0x20] sm:$0xff] %vm259_vm1, %v1004_v2  ;;  %265 = vst.msk [vmem:[#allocation2 + $0x28] sm:$0xff] %vm259_vm1, %v1004_v2  ;;  %953 = vmatprep.subr.msk.bf16.mxu0 %vm423_vm0, %v373_v1  ;;  %954 = vmatprep.subr.msk.bf16.mxu1 %vm423_vm0, %v373_v1  ;;  %v425_v3 = vsel %vm423_vm0, %v373_v1, 0  ;;  %v324_v4 = vld [vmem:[%s1102_s23] sm:$0xff]  ;;  %v325_v5 = vld [vmem:[%s1102_s23 + $0x8] sm:$0xff] }
  0x10   : > { %266 = vst.msk [vmem:[#allocation2 + $0x30] sm:$0xff] %vm259_vm1, %v1004_v2  ;;  %267 = vst.msk [vmem:[#allocation2 + $0x38] sm:$0xff] %vm259_vm1, %v1004_v2  ;;  %918 = vmatpush3.bf16.msra.mxu0 %v425_v3  ;;  %952 = vmatpush3.bf16.msra.mxu1 %v425_v3  ;;  %v340_v6 = vld [vmem:[%s1102_s23 + $0x80] sm:$0xff]  ;;  %v356_v7 = vpack.c.bf16 %v325_v5, %v324_v4  ;;  %v341_v8 = vld [vmem:[%s1102_s23 + $0x88] sm:$0xff] }
  0x11   : > { %268 = vst.msk [vmem:[#allocation2 + $0x40] sm:$0xff] %vm259_vm1, %v1004_v2  ;;  %269 = vst.msk [vmem:[#allocation2 + $0x48] sm:$0xff] %vm259_vm1, %v1004_v2  ;;  %v326_v9 = vld [vmem:[%s1102_s23 + $0x10] sm:$0xff]  ;;  %v327_v10 = vld [vmem:[%s1102_s23 + $0x18] sm:$0xff]  ;;  %v364_v11 = vpack.c.bf16 %v341_v8, %v340_v6 }
  0x12   : > { %270 = vst.msk [vmem:[#allocation2 + $0x50] sm:$0xff] %vm259_vm1, %v1004_v2  ;;  %271 = vst.msk [vmem:[#allocation2 + $0x58] sm:$0xff] %vm259_vm1, %v1004_v2  ;;  %v357_v12 = vpack.c.bf16 %v327_v10, %v326_v9  ;;  %v342_v13 = vld [vmem:[%s1102_s23 + $0x90] sm:$0xff]  ;;  %v343_v14 = vld [vmem:[%s1102_s23 + $0x98] sm:$0xff]  ;;  %919 = vmatprep.mubr.msk.bf16.mxu0 %vm374_vm2, %v356_v7 }
  0x13   : > { %272 = vst.msk [vmem:[#allocation2 + $0x60] sm:$0xff] %vm259_vm1, %v1004_v2  ;;  %273 = vst.msk [vmem:[#allocation2 + $0x68] sm:$0xff] %vm259_vm1, %v1004_v2  ;;  %v328_v15 = vld [vmem:[%s1102_s23 + $0x20] sm:$0xff]  ;;  %v365_v16 = vpack.c.bf16 %v343_v14, %v342_v13  ;;  %v329_v17 = vld [vmem:[%s1102_s23 + $0x28] sm:$0xff]  ;;  %935 = vmatprep.mubr.msk.bf16.mxu1 %vm374_vm2, %v364_v11 }
  0x14   : > { %274 = vst.msk [vmem:[#allocation2 + $0x70] sm:$0xff] %vm259_vm1, %v1004_v2  ;;  %275 = vst.msk [vmem:[#allocation2 + $0x78] sm:$0xff] %vm259_vm1, %v1004_v2  ;;  %v344_v18 = vld [vmem:[%s1102_s23 + $0xa0] sm:$0xff]  ;;  %v345_v19 = vld [vmem:[%s1102_s23 + $0xa8] sm:$0xff]  ;;  %920 = vmatmul.mubr.msk.bf16.vlgmr.msra.gmra.mxu0 %vm374_vm2, %v357_v12  ;;  %v358_v20 = vpack.c.bf16 %v329_v17, %v328_v15 }
  0x15   : > { %276 = vst.msk [vmem:[#allocation2 + $0x80] sm:$0xff] %vm259_vm1, %v1004_v2  ;;  %277 = vst.msk [vmem:[#allocation2 + $0x88] sm:$0xff] %vm259_vm1, %v1004_v2  ;;  %v366_v21 = vpack.c.bf16 %v345_v19, %v344_v18  ;;  %936 = vmatmul.mubr.msk.bf16.vlgmr.msra.gmra.mxu1 %vm374_vm2, %v365_v16  ;;  %v330_v22 = vld [vmem:[%s1102_s23 + $0x30] sm:$0xff]  ;;  %v331_v23 = vld [vmem:[%s1102_s23 + $0x38] sm:$0xff] }
  0x16   : > { %278 = vst.msk [vmem:[#allocation2 + $0x90] sm:$0xff] %vm259_vm1, %v1004_v2  ;;  %279 = vst.msk [vmem:[#allocation2 + $0x98] sm:$0xff] %vm259_vm1, %v1004_v2  ;;  %v346_v24 = vld [vmem:[%s1102_s23 + $0xb0] sm:$0xff]  ;;  %923 = vmatprep.mubr.msk.bf16.mxu0 %vm374_vm2, %v358_v20  ;;  %v347_v25 = vld [vmem:[%s1102_s23 + $0xb8] sm:$0xff]  ;;  %v359_v30 = vpack.c.bf16 %v331_v23, %v330_v22 }
  0x17   : > { %280 = vst.msk [vmem:[#allocation2 + $0xa0] sm:$0xff] %vm259_vm1, %v1004_v2  ;;  %281 = vst.msk [vmem:[#allocation2 + $0xa8] sm:$0xff] %vm259_vm1, %v1004_v2  ;;  %939 = vmatprep.mubr.msk.bf16.mxu1 %vm374_vm2, %v366_v21  ;;  %v332_v26 = vld [vmem:[%s1102_s23 + $0x40] sm:$0xff]  ;;  %v333_v27 = vld [vmem:[%s1102_s23 + $0x48] sm:$0xff]  ;;  %v367_v31 = vpack.c.bf16 %v347_v25, %v346_v24 }
  0x18   : > { %282 = vst.msk [vmem:[#allocation2 + $0xb0] sm:$0xff] %vm259_vm1, %v1004_v2  ;;  %283 = vst.msk [vmem:[#allocation2 + $0xb8] sm:$0xff] %vm259_vm1, %v1004_v2  ;;  %v348_v28 = vld [vmem:[%s1102_s23 + $0xc0] sm:$0xff]  ;;  %v349_v29 = vld [vmem:[%s1102_s23 + $0xc8] sm:$0xff]  ;;  %v360_v32 = vpack.c.bf16 %v333_v27, %v332_v26 }
  0x19   : > { %284 = vst.msk [vmem:[#allocation2 + $0xc0] sm:$0xff] %vm259_vm1, %v1004_v2  ;;  %285 = vst.msk [vmem:[#allocation2 + $0xc8] sm:$0xff] %vm259_vm1, %v1004_v2  ;;  %v368_v33 = vpack.c.bf16 %v349_v29, %v348_v28  ;;  %v334_v34 = vld [vmem:[%s1102_s23 + $0x50] sm:$0xff]  ;;  %v335_v35 = vld [vmem:[%s1102_s23 + $0x58] sm:$0xff] }
  0x1a   : > { %286 = vst.msk [vmem:[#allocation2 + $0xd0] sm:$0xff] %vm259_vm1, %v1004_v2  ;;  %287 = vst.msk [vmem:[#allocation2 + $0xd8] sm:$0xff] %vm259_vm1, %v1004_v2  ;;  %v350_v36 = vld [vmem:[%s1102_s23 + $0xd0] sm:$0xff]  ;;  %v351_v37 = vld [vmem:[%s1102_s23 + $0xd8] sm:$0xff]  ;;  %v361_v42 = vpack.c.bf16 %v335_v35, %v334_v34 }
  0x1b   : > { %288 = vst.msk [vmem:[#allocation2 + $0xe0] sm:$0xff] %vm259_vm1, %v1004_v2  ;;  %289 = vst.msk [vmem:[#allocation2 + $0xe8] sm:$0xff] %vm259_vm1, %v1004_v2  ;;  %v336_v38 = vld [vmem:[%s1102_s23 + $0x60] sm:$0xff]  ;;  %v337_v39 = vld [vmem:[%s1102_s23 + $0x68] sm:$0xff]  ;;  %v369_v43 = vpack.c.bf16 %v351_v37, %v350_v36 }
  0x1c   : > { %290 = vst.msk [vmem:[#allocation2 + $0xf0] sm:$0xff] %vm259_vm1, %v1004_v2  ;;  %291 = vst.msk [vmem:[#allocation2 + $0xf8] sm:$0xff] %vm259_vm1, %v1004_v2  ;;  %924 = vmatmul.mubr.msk.bf16.gmra.mxu0 %vm374_vm2, %v359_v30  ;;  %v352_v40 = vld [vmem:[%s1102_s23 + $0xe0] sm:$0xff]  ;;  %v353_v41 = vld [vmem:[%s1102_s23 + $0xe8] sm:$0xff]  ;;  %v362_v44 = vpack.c.bf16 %v337_v39, %v336_v38 }
  0x1d   : > { %940 = vmatmul.mubr.msk.bf16.gmra.mxu1 %vm374_vm2, %v367_v31  ;;  %927 = vmatprep.mubr.msk.bf16.mxu0 %vm374_vm2, %v360_v32  ;;  %v370_v45 = vpack.c.bf16 %v353_v41, %v352_v40  ;;  %v338_v46 = vld [vmem:[%s1102_s23 + $0x70] sm:$0xff]  ;;  %v339_v47 = vld [vmem:[%s1102_s23 + $0x78] sm:$0xff]  ;;  %v292_v55 = vld [vmem:[#allocation2] sm:$0xff] }
  0x1e   : > { %943 = vmatprep.mubr.msk.bf16.mxu1 %vm374_vm2, %v368_v33  ;;  %v354_v48 = vld [vmem:[%s1102_s23 + $0xf0] sm:$0xff]  ;;  %v355_v49 = vld [vmem:[%s1102_s23 + $0xf8] sm:$0xff]  ;;  %v363_v50 = vpack.c.bf16 %v339_v47, %v338_v46  ;;  %v308_v58 = vld [vmem:[#allocation2 + $0x80] sm:$0xff] }
  0x1f   : > { %v371_v51 = vpack.c.bf16 %v355_v49, %v354_v48  ;;  %v294_v52 = vld [vmem:[#allocation2 + $0x10] sm:$0xff]  ;;  %v295_v61 = vld [vmem:[#allocation2 + $0x18] sm:$0xff]  ;;  %v293_v3 = vld [vmem:[#allocation2 + $0x8] sm:$0xff] }
  0x20   : > { %v310_v53 = vld [vmem:[#allocation2 + $0x90] sm:$0xff]  ;;  %v311_v0 = vld [vmem:[#allocation2 + $0x98] sm:$0xff]  ;;  %v309_v6 = vld [vmem:[#allocation2 + $0x88] sm:$0xff] }
  0x21   : > { %v298_v9 = vld [vmem:[#allocation2 + $0x30] sm:$0xff]  ;;  %v1160_v13 = vld [vmem:[%s1303_s2] ss:$0 sm:$0xff]  ;;  %v299_v23 = vld [vmem:[#allocation2 + $0x38] sm:$0xff] }
  0x22   : > { %v314_v12 = vld [vmem:[#allocation2 + $0xb0] sm:$0xff]  ;;  %v296_v16 = vld [vmem:[#allocation2 + $0x20] sm:$0xff]  ;;  %v315_v28 = vld [vmem:[#allocation2 + $0xb8] sm:$0xff] }
  0x23   : > { %v312_v19 = vld [vmem:[#allocation2 + $0xa0] sm:$0xff]  ;;  %v297_v33 = vld [vmem:[#allocation2 + $0x28] sm:$0xff]  ;;  %v318_v48 = vld [vmem:[#allocation2 + $0xd0] sm:$0xff] }
  0x24   : > { %928 = vmatmul.mubr.msk.bf16.gmra.mxu0 %vm374_vm2, %v361_v42  ;;  %v313_v38 = vld [vmem:[#allocation2 + $0xa8] sm:$0xff] }
  0x25   : > { %944 = vmatmul.mubr.msk.bf16.gmra.mxu1 %vm374_vm2, %v369_v43  ;;  %931 = vmatprep.mubr.msk.bf16.mxu0 %vm374_vm2, %v362_v44  ;;  %v302_v43 = vld [vmem:[#allocation2 + $0x50] sm:$0xff] }
  0x26   : > { %947 = vmatprep.mubr.msk.bf16.mxu1 %vm374_vm2, %v370_v45 }
  0x2c   : > { %932 = vmatmul.mubr.msk.bf16.gmra.mxu0 %vm374_vm2, %v363_v50 }
  0x2d   : > { %948 = vmatmul.mubr.msk.bf16.gmra.mxu1 %vm374_vm2, %v371_v51 }
  0xd4   : > { %v921_v54 = vpop.f32.mrf.mxu0 }
  0xd5   : > { %v590_v56 = vadd.f32 %v921_v54, %v294_v52  ;;  %v937_v57 = vpop.f32.mrf.mxu1 }
  0xd6   : > { %v606_v59 = vadd.f32 %v937_v57, %v310_v53  ;;  %v461_v60 = vpop.f32.mrf.mxu0  ;;  %v300_v53 = vld [vmem:[#allocation2 + $0x40] sm:$0xff] }
  0xd7   : > { %623 = vst.msk [vmem:[#allocation2 + $0x10] sm:$0xff] %vm259_vm1, %v590_v56  ;;  %v588_v62 = vadd.f32 %v461_v60, %v292_v55  ;;  %v525_v63 = vpop.f32.mrf.mxu1 }
  0xd8   : > { %639 = vst.msk [vmem:[#allocation2 + $0x90] sm:$0xff] %vm259_vm1, %v606_v59  ;;  %v604_v1 = vadd.f32 %v525_v63, %v308_v58  ;;  %v922_v2 = vpop.f32.mrf.mxu0  ;;  %v316_v58 = vld [vmem:[#allocation2 + $0xc0] sm:$0xff]  ;;  %v303_v63 = vld [vmem:[#allocation2 + $0x58] sm:$0xff] }
  0xd9   : > { %621 = vst.msk [vmem:[#allocation2] sm:$0xff] %vm259_vm1, %v588_v62  ;;  %v591_v4 = vadd.f32 %v922_v2, %v295_v61  ;;  %v938_v5 = vpop.f32.mrf.mxu1 }
  0xda   : > { %637 = vst.msk [vmem:[#allocation2 + $0x80] sm:$0xff] %vm259_vm1, %v604_v1  ;;  %v607_v7 = vadd.f32 %v938_v5, %v311_v0  ;;  %v464_v8 = vpop.f32.mrf.mxu0 }
  0xdb   : > { %624 = vst.msk [vmem:[#allocation2 + $0x18] sm:$0xff] %vm259_vm1, %v591_v4  ;;  %v589_v10 = vadd.f32 %v464_v8, %v293_v3  ;;  %v528_v11 = vpop.f32.mrf.mxu1  ;;  %v319_v4 = vld [vmem:[#allocation2 + $0xd8] sm:$0xff] }
  0xdc   : > { %640 = vst.msk [vmem:[#allocation2 + $0x98] sm:$0xff] %vm259_vm1, %v607_v7  ;;  %v605_v14 = vadd.f32 %v528_v11, %v309_v6  ;;  %v925_v15 = vpop.f32.mrf.mxu0 }
  0xdd   : > { %622 = vst.msk [vmem:[#allocation2 + $0x8] sm:$0xff] %vm259_vm1, %v589_v10  ;;  %v594_v17 = vadd.f32 %v925_v15, %v298_v9  ;;  %v941_v18 = vpop.f32.mrf.mxu1  ;;  %v301_v9 = vld [vmem:[#allocation2 + $0x48] sm:$0xff] }
  0xde   : > { %v658_v20 = vld [vmem:[#allocation2 + $0x10] sm:$0xff]  ;;  %638 = vst.msk [vmem:[#allocation2 + $0x88] sm:$0xff] %vm259_vm1, %v605_v14  ;;  %v610_v21 = vadd.f32 %v941_v18, %v314_v12  ;;  %v477_v22 = vpop.f32.mrf.mxu0  ;;  %v317_v15 = vld [vmem:[#allocation2 + $0xc8] sm:$0xff] }
  0xdf   : > { %v697_v24 = vadd.f32 %v1160_v13, %v658_v20  ;;  %v674_v25 = vld [vmem:[#allocation2 + $0x90] sm:$0xff]  ;;  %627 = vst.msk [vmem:[#allocation2 + $0x30] sm:$0xff] %vm259_vm1, %v594_v17  ;;  %v592_v26 = vadd.f32 %v477_v22, %v296_v16  ;;  %v541_v27 = vpop.f32.mrf.mxu1 }
  0xe0   : > { %v713_v29 = vadd.f32 %v1160_v13, %v674_v25  ;;  %v656_v30 = vld [vmem:[#allocation2] sm:$0xff]  ;;  %643 = vst.msk [vmem:[#allocation2 + $0xb0] sm:$0xff] %vm259_vm1, %v610_v21  ;;  %v608_v31 = vadd.f32 %v541_v27, %v312_v19  ;;  %v926_v32 = vpop.f32.mrf.mxu0  ;;  %v306_v20 = vld [vmem:[#allocation2 + $0x70] sm:$0xff] }
  0xe1   : > { %729 = vst.msk [vmem:[%s1169_s28 + $0x10] sm:$0xff] %vm259_vm1, %v697_v24  ;;  %v695_v34 = vadd.f32 %v1160_v13, %v656_v30  ;;  %v672_v35 = vld [vmem:[#allocation2 + $0x80] sm:$0xff]  ;;  %625 = vst.msk [vmem:[#allocation2 + $0x20] sm:$0xff] %vm259_vm1, %v592_v26  ;;  %v595_v36 = vadd.f32 %v926_v32, %v299_v23  ;;  %v942_v37 = vpop.f32.mrf.mxu1  ;;  %v322_v25 = vld [vmem:[#allocation2 + $0xf0] sm:$0xff] }
  0xe2   : > { %745 = vst.msk [vmem:[%s1169_s28 + $0x90] sm:$0xff] %vm259_vm1, %v713_v29  ;;  %v711_v39 = vadd.f32 %v1160_v13, %v672_v35  ;;  %v659_v40 = vld [vmem:[#allocation2 + $0x18] sm:$0xff]  ;;  %641 = vst.msk [vmem:[#allocation2 + $0xa0] sm:$0xff] %vm259_vm1, %v608_v31  ;;  %v611_v41 = vadd.f32 %v942_v37, %v315_v28  ;;  %v480_v42 = vpop.f32.mrf.mxu0  ;;  %v304_v30 = vld [vmem:[#allocation2 + $0x60] sm:$0xff] }
  0xe3   : > { %727 = vst.msk [vmem:[%s1169_s28] sm:$0xff] %vm259_vm1, %v695_v34  ;;  %v698_v44 = vadd.f32 %v1160_v13, %v659_v40  ;;  %v675_v45 = vld [vmem:[#allocation2 + $0x98] sm:$0xff]  ;;  %628 = vst.msk [vmem:[#allocation2 + $0x38] sm:$0xff] %vm259_vm1, %v595_v36  ;;  %v593_v46 = vadd.f32 %v480_v42, %v297_v33  ;;  %v544_v47 = vpop.f32.mrf.mxu1  ;;  %v320_v35 = vld [vmem:[#allocation2 + $0xe0] sm:$0xff] }
  0xe4   : > { %743 = vst.msk [vmem:[%s1169_s28 + $0x80] sm:$0xff] %vm259_vm1, %v711_v39  ;;  %v714_v49 = vadd.f32 %v1160_v13, %v675_v45  ;;  %v657_v50 = vld [vmem:[#allocation2 + $0x8] sm:$0xff]  ;;  %644 = vst.msk [vmem:[#allocation2 + $0xb8] sm:$0xff] %vm259_vm1, %v611_v41  ;;  %v609_v51 = vadd.f32 %v544_v47, %v313_v38  ;;  %v929_v52 = vpop.f32.mrf.mxu0  ;;  %v307_v40 = vld [vmem:[#allocation2 + $0x78] sm:$0xff] }
  0xe5   : > { %730 = vst.msk [vmem:[%s1169_s28 + $0x18] sm:$0xff] %vm259_vm1, %v698_v44  ;;  %v696_v54 = vadd.f32 %v1160_v13, %v657_v50  ;;  %v673_v55 = vld [vmem:[#allocation2 + $0x88] sm:$0xff]  ;;  %626 = vst.msk [vmem:[#allocation2 + $0x28] sm:$0xff] %vm259_vm1, %v593_v46  ;;  %v598_v56 = vadd.f32 %v929_v52, %v302_v43  ;;  %v945_v57 = vpop.f32.mrf.mxu1  ;;  %v323_v45 = vld [vmem:[#allocation2 + $0xf8] sm:$0xff] }
  0xe6   : > { %746 = vst.msk [vmem:[%s1169_s28 + $0x98] sm:$0xff] %vm259_vm1, %v714_v49  ;;  %v712_v59 = vadd.f32 %v1160_v13, %v673_v55  ;;  %v662_v60 = vld [vmem:[#allocation2 + $0x30] sm:$0xff]  ;;  %642 = vst.msk [vmem:[#allocation2 + $0xa8] sm:$0xff] %vm259_vm1, %v609_v51  ;;  %v614_v61 = vadd.f32 %v945_v57, %v318_v48  ;;  %v493_v62 = vpop.f32.mrf.mxu0  ;;  %v305_v50 = vld [vmem:[#allocation2 + $0x68] sm:$0xff] }
  0xe7   : > { %728 = vst.msk [vmem:[%s1169_s28 + $0x8] sm:$0xff] %vm259_vm1, %v696_v54  ;;  %v701_v0 = vadd.f32 %v1160_v13, %v662_v60  ;;  %v678_v1 = vld [vmem:[#allocation2 + $0xb0] sm:$0xff]  ;;  %631 = vst.msk [vmem:[#allocation2 + $0x50] sm:$0xff] %vm259_vm1, %v598_v56  ;;  %v596_v2 = vadd.f32 %v493_v62, %v300_v53  ;;  %v557_v3 = vpop.f32.mrf.mxu1  ;;  %v321_v55 = vld [vmem:[#allocation2 + $0xe8] sm:$0xff] }
  0xe8   : > { %744 = vst.msk [vmem:[%s1169_s28 + $0x88] sm:$0xff] %vm259_vm1, %v712_v59  ;;  %v717_v5 = vadd.f32 %v1160_v13, %v678_v1  ;;  %v660_v6 = vld [vmem:[#allocation2 + $0x20] sm:$0xff]  ;;  %647 = vst.msk [vmem:[#allocation2 + $0xd0] sm:$0xff] %vm259_vm1, %v614_v61  ;;  %v612_v7 = vadd.f32 %v557_v3, %v316_v58  ;;  %v930_v8 = vpop.f32.mrf.mxu0 }
  0xe9   : > { %733 = vst.msk [vmem:[%s1169_s28 + $0x30] sm:$0xff] %vm259_vm1, %v701_v0  ;;  %v699_v10 = vadd.f32 %v1160_v13, %v660_v6  ;;  %v676_v11 = vld [vmem:[#allocation2 + $0xa0] sm:$0xff]  ;;  %629 = vst.msk [vmem:[#allocation2 + $0x40] sm:$0xff] %vm259_vm1, %v596_v2  ;;  %v599_v12 = vadd.f32 %v930_v8, %v303_v63  ;;  %v946_v14 = vpop.f32.mrf.mxu1 }
  0xea   : > { %749 = vst.msk [vmem:[%s1169_s28 + $0xb0] sm:$0xff] %vm259_vm1, %v717_v5  ;;  %v715_v16 = vadd.f32 %v1160_v13, %v676_v11  ;;  %v663_v17 = vld [vmem:[#allocation2 + $0x38] sm:$0xff]  ;;  %645 = vst.msk [vmem:[#allocation2 + $0xc0] sm:$0xff] %vm259_vm1, %v612_v7  ;;  %v615_v18 = vadd.f32 %v946_v14, %v319_v4  ;;  %v496_v19 = vpop.f32.mrf.mxu0 }
  0xeb   : > { %731 = vst.msk [vmem:[%s1169_s28 + $0x20] sm:$0xff] %vm259_vm1, %v699_v10  ;;  %v702_v21 = vadd.f32 %v1160_v13, %v663_v17  ;;  %v679_v22 = vld [vmem:[#allocation2 + $0xb8] sm:$0xff]  ;;  %632 = vst.msk [vmem:[#allocation2 + $0x58] sm:$0xff] %vm259_vm1, %v599_v12  ;;  %v597_v23 = vadd.f32 %v496_v19, %v301_v9  ;;  %v560_v24 = vpop.f32.mrf.mxu1 }
  0xec   : > { %747 = vst.msk [vmem:[%s1169_s28 + $0xa0] sm:$0xff] %vm259_vm1, %v715_v16  ;;  %v718_v26 = vadd.f32 %v1160_v13, %v679_v22  ;;  %v661_v27 = vld [vmem:[#allocation2 + $0x28] sm:$0xff]  ;;  %648 = vst.msk [vmem:[#allocation2 + $0xd8] sm:$0xff] %vm259_vm1, %v615_v18  ;;  %v613_v28 = vadd.f32 %v560_v24, %v317_v15  ;;  %v933_v29 = vpop.f32.mrf.mxu0 }
  0xed   : > { %734 = vst.msk [vmem:[%s1169_s28 + $0x38] sm:$0xff] %vm259_vm1, %v702_v21  ;;  %v700_v31 = vadd.f32 %v1160_v13, %v661_v27  ;;  %v677_v32 = vld [vmem:[#allocation2 + $0xa8] sm:$0xff]  ;;  %630 = vst.msk [vmem:[#allocation2 + $0x48] sm:$0xff] %vm259_vm1, %v597_v23  ;;  %v602_v33 = vadd.f32 %v933_v29, %v306_v20  ;;  %v949_v34 = vpop.f32.mrf.mxu1 }
  0xee   : > { %750 = vst.msk [vmem:[%s1169_s28 + $0xb8] sm:$0xff] %vm259_vm1, %v718_v26  ;;  %v716_v36 = vadd.f32 %v1160_v13, %v677_v32  ;;  %v666_v37 = vld [vmem:[#allocation2 + $0x50] sm:$0xff]  ;;  %646 = vst.msk [vmem:[#allocation2 + $0xc8] sm:$0xff] %vm259_vm1, %v613_v28  ;;  %v618_v38 = vadd.f32 %v949_v34, %v322_v25  ;;  %v509_v39 = vpop.f32.mrf.mxu0 }
  0xef   : > { %732 = vst.msk [vmem:[%s1169_s28 + $0x28] sm:$0xff] %vm259_vm1, %v700_v31  ;;  %v705_v41 = vadd.f32 %v1160_v13, %v666_v37  ;;  %v682_v42 = vld [vmem:[#allocation2 + $0xd0] sm:$0xff]  ;;  %635 = vst.msk [vmem:[#allocation2 + $0x70] sm:$0xff] %vm259_vm1, %v602_v33  ;;  %v600_v43 = vadd.f32 %v509_v39, %v304_v30  ;;  %v573_v44 = vpop.f32.mrf.mxu1 }
  0xf0   : > { %748 = vst.msk [vmem:[%s1169_s28 + $0xa8] sm:$0xff] %vm259_vm1, %v716_v36  ;;  %v721_v46 = vadd.f32 %v1160_v13, %v682_v42  ;;  %v664_v47 = vld [vmem:[#allocation2 + $0x40] sm:$0xff]  ;;  %651 = vst.msk [vmem:[#allocation2 + $0xf0] sm:$0xff] %vm259_vm1, %v618_v38  ;;  %v616_v48 = vadd.f32 %v573_v44, %v320_v35  ;;  %v934_v49 = vpop.f32.mrf.mxu0 }
  0xf1   : > { %737 = vst.msk [vmem:[%s1169_s28 + $0x50] sm:$0xff] %vm259_vm1, %v705_v41  ;;  %v703_v51 = vadd.f32 %v1160_v13, %v664_v47  ;;  %v680_v52 = vld [vmem:[#allocation2 + $0xc0] sm:$0xff]  ;;  %633 = vst.msk [vmem:[#allocation2 + $0x60] sm:$0xff] %vm259_vm1, %v600_v43  ;;  %v603_v53 = vadd.f32 %v934_v49, %v307_v40  ;;  %v950_v54 = vpop.f32.mrf.mxu1 }
  0xf2   : > { %753 = vst.msk [vmem:[%s1169_s28 + $0xd0] sm:$0xff] %vm259_vm1, %v721_v46  ;;  %v719_v56 = vadd.f32 %v1160_v13, %v680_v52  ;;  %v667_v57 = vld [vmem:[#allocation2 + $0x58] sm:$0xff]  ;;  %649 = vst.msk [vmem:[#allocation2 + $0xe0] sm:$0xff] %vm259_vm1, %v616_v48  ;;  %v619_v58 = vadd.f32 %v950_v54, %v323_v45  ;;  %v512_v59 = vpop.f32.mrf.mxu0 }
  0xf3   : > { %735 = vst.msk [vmem:[%s1169_s28 + $0x40] sm:$0xff] %vm259_vm1, %v703_v51  ;;  %v706_v60 = vadd.f32 %v1160_v13, %v667_v57  ;;  %v683_v61 = vld [vmem:[#allocation2 + $0xd8] sm:$0xff]  ;;  %636 = vst.msk [vmem:[#allocation2 + $0x78] sm:$0xff] %vm259_vm1, %v603_v53  ;;  %v601_v62 = vadd.f32 %v512_v59, %v305_v50  ;;  %v576_v63 = vpop.f32.mrf.mxu1 }
  0xf4   : > { %751 = vst.msk [vmem:[%s1169_s28 + $0xc0] sm:$0xff] %vm259_vm1, %v719_v56  ;;  %v722_v0 = vadd.f32 %v1160_v13, %v683_v61  ;;  %v665_v1 = vld [vmem:[#allocation2 + $0x48] sm:$0xff]  ;;  %652 = vst.msk [vmem:[#allocation2 + $0xf8] sm:$0xff] %vm259_vm1, %v619_v58  ;;  %v617_v2 = vadd.f32 %v576_v63, %v321_v55 }
  0xf5   : > { %738 = vst.msk [vmem:[%s1169_s28 + $0x58] sm:$0xff] %vm259_vm1, %v706_v60  ;;  %v704_v3 = vadd.f32 %v1160_v13, %v665_v1  ;;  %v681_v4 = vld [vmem:[#allocation2 + $0xc8] sm:$0xff]  ;;  %634 = vst.msk [vmem:[#allocation2 + $0x68] sm:$0xff] %vm259_vm1, %v601_v62 }
  0xf6   : > { %754 = vst.msk [vmem:[%s1169_s28 + $0xd8] sm:$0xff] %vm259_vm1, %v722_v0  ;;  %v720_v5 = vadd.f32 %v1160_v13, %v681_v4  ;;  %v670_v6 = vld [vmem:[#allocation2 + $0x70] sm:$0xff]  ;;  %650 = vst.msk [vmem:[#allocation2 + $0xe8] sm:$0xff] %vm259_vm1, %v617_v2 }
  0xf7   : > { %736 = vst.msk [vmem:[%s1169_s28 + $0x48] sm:$0xff] %vm259_vm1, %v704_v3  ;;  %v709_v7 = vadd.f32 %v1160_v13, %v670_v6  ;;  %v686_v8 = vld [vmem:[#allocation2 + $0xf0] sm:$0xff] }
  0xf8   : > { %752 = vst.msk [vmem:[%s1169_s28 + $0xc8] sm:$0xff] %vm259_vm1, %v720_v5  ;;  %v725_v9 = vadd.f32 %v1160_v13, %v686_v8  ;;  %v668_v10 = vld [vmem:[#allocation2 + $0x60] sm:$0xff] }
  0xf9   : > { %741 = vst.msk [vmem:[%s1169_s28 + $0x70] sm:$0xff] %vm259_vm1, %v709_v7  ;;  %v707_v11 = vadd.f32 %v1160_v13, %v668_v10  ;;  %v684_v12 = vld [vmem:[#allocation2 + $0xe0] sm:$0xff] }
  0xfa   : > { %757 = vst.msk [vmem:[%s1169_s28 + $0xf0] sm:$0xff] %vm259_vm1, %v725_v9  ;;  %v723_v14 = vadd.f32 %v1160_v13, %v684_v12  ;;  %v671_v15 = vld [vmem:[#allocation2 + $0x78] sm:$0xff] }
  0xfb   : > { %739 = vst.msk [vmem:[%s1169_s28 + $0x60] sm:$0xff] %vm259_vm1, %v707_v11  ;;  %v710_v16 = vadd.f32 %v1160_v13, %v671_v15  ;;  %v687_v17 = vld [vmem:[#allocation2 + $0xf8] sm:$0xff] }
  0xfc   : > { %755 = vst.msk [vmem:[%s1169_s28 + $0xe0] sm:$0xff] %vm259_vm1, %v723_v14  ;;  %v726_v18 = vadd.f32 %v1160_v13, %v687_v17  ;;  %v669_v19 = vld [vmem:[#allocation2 + $0x68] sm:$0xff] }
  0xfd   : > { %742 = vst.msk [vmem:[%s1169_s28 + $0x78] sm:$0xff] %vm259_vm1, %v710_v16  ;;  %v708_v20 = vadd.f32 %v1160_v13, %v669_v19  ;;  %v685_v21 = vld [vmem:[#allocation2 + $0xe8] sm:$0xff] }
  0xfe   : > { %758 = vst.msk [vmem:[%s1169_s28 + $0xf8] sm:$0xff] %vm259_vm1, %v726_v18  ;;  %v724_v22 = vadd.f32 %v1160_v13, %v685_v21 }
  0xff   : > { %740 = vst.msk [vmem:[%s1169_s28 + $0x68] sm:$0xff] %vm259_vm1, %v708_v20 }
 0x100   : > { %756 = vst.msk [vmem:[%s1169_s28 + $0xe8] sm:$0xff] %vm259_vm1, %v724_v22 }
 0x101 PF: > { %s13_s14 = sadd.s32 1, %s1002_s14   ;;  %s1306_s12 = smov %s998_s13 }
 0x102   : > { %p10_p5 = scmp.ge.s32.totalorder %s13_s14, 4   ;;  %s1307_s13 = smov %s1309_s15 }
 0x104   :  { %12 = sbr.rel (!%p10_p5) target bundleno = 2 (0x2), region = 76 }

</bundles_post_ra>
